<compile_context>
chip_gen: v6e
topology: v6e:2x2x1
jax: 0.10.0
libtpu: 0.0.40
codegen_flags: <defaults>
</compile_context>

<pallas_src>
import jax
import jax.numpy as jnp
from jax.experimental import pallas as pl
from jax.experimental.pallas import tpu as pltpu


def _concat_kernel(x2_ref, xf_ref, pw_ref, pb_ref, fcw_ref, fcb_ref,
                   logits_ref, patch_ref):
    # Patch head over ALL tokens: (TB*N, E) @ (E, Cp) + (1, Cp).
    patch_ref[...] = (
        jnp.dot(x2_ref[...], pw_ref[...], preferred_element_type=jnp.float32)
        + pb_ref[...])
    # fc head over flattened tokens: (TB, N*E) @ (N*E, Cp) + (1, Cp).
    logits_ref[...] = (
        jnp.dot(xf_ref[...], fcw_ref[...], preferred_element_type=jnp.float32)
        + fcb_ref[...])


def concat_forward(x, params, *, tb=8):
    """x: (B, N, E) float32.

    params (stored already transposed to (in, out)):
      fc_w: (N*E, C), fc_b: (C,), patch_w: (E, C), patch_b: (C,)
    Returns (logits (B, C), patch_label (B, N-1, C)).
    """
    B, N, E = x.shape
    NE = N * E
    fc_w, fc_b = params["fc_w"], params["fc_b"]
    pw, pb = params["patch_w"], params["patch_b"]
    C = pw.shape[1]
    assert fc_w.shape == (NE, C), fc_w.shape

    # ---- lane-dense class dim: pad C up to a multiple of 128 ----
    Cp = max(128, ((C + 127) // 128) * 128)
    fc_w_p = jnp.pad(fc_w, ((0, 0), (0, Cp - C)))
    pw_p = jnp.pad(pw, ((0, 0), (0, Cp - C)))
    fc_b_p = jnp.pad(fc_b, (0, Cp - C)).reshape(1, Cp)
    pb_p = jnp.pad(pb, (0, Cp - C)).reshape(1, Cp)

    # ---- batch tiling: TB batch elements per grid step ----
    TB = B if B <= tb else tb
    if TB < B:
        assert TB % 8 == 0, "tb must be a multiple of 8 when tb < B"
    Bp = pl.cdiv(B, TB) * TB
    if Bp != B:
        x = jnp.pad(x, ((0, Bp - B), (0, 0), (0, 0)))

    # Two free (row-major) HBM views of x: no in-kernel reshapes needed.
    x2d = x.reshape(Bp * N, E)   # for patch_head
    xf = x.reshape(Bp, NE)       # for fc

    grid = (Bp // TB,)
    full = lambda shape: pl.BlockSpec(shape, lambda i: (0,) * len(shape))

    # Double-buffered block bytes + 50% headroom, capped for v7x (64 MiB VMEM).
    blk_elems = (2 * TB * N * E + 2 * TB * NE
                 + 2 * (E * Cp + NE * Cp + 2 * Cp)
                 + 2 * (TB * Cp + TB * N * Cp))
    vmem_limit = int(min(64 * 1024 * 1024,
                         max(32 * 1024 * 1024, blk_elems * 4 * 1.5)))

    logits_p, patch_p = pl.pallas_call(
        _concat_kernel,
        out_shape=(
            jax.ShapeDtypeStruct((Bp, Cp), jnp.float32),
            jax.ShapeDtypeStruct((Bp * N, Cp), jnp.float32),
        ),
        grid_spec=pltpu.PrefetchScalarGridSpec(
            num_scalar_prefetch=0,
            grid=grid,
            in_specs=[
                pl.BlockSpec((TB * N, E), lambda i: (i, 0)),   # x viewed (B*N, E)
                pl.BlockSpec((TB, NE), lambda i: (i, 0)),      # x viewed (B, N*E)
                full((E, Cp)),                                 # patch_head.weight^T (padded)
                full((1, Cp)),                                 # patch_head.bias (padded)
                full((NE, Cp)),                                # fc.weight^T (padded)
                full((1, Cp)),                                 # fc.bias (padded)
            ],
            out_specs=[
                pl.BlockSpec((TB, Cp), lambda i: (i, 0)),      # logits
                pl.BlockSpec((TB * N, Cp), lambda i: (i, 0)),  # patch (all N tokens)
            ],
        ),
        compiler_params=pltpu.CompilerParams(
            dimension_semantics=("parallel",),
            vmem_limit_bytes=vmem_limit,
        ),
    )(x2d, xf, pw_p, pb_p, fc_w_p, fc_b_p)

    logits = logits_p[:B, :C]
    patch = patch_p.reshape(Bp, N, Cp)[:B, 1:, :C]   # drop CLS row + pad lanes
    return logits, patch


def init_params(key, embed_dim, concat_dim, num_classes):
    ks = jax.random.split(key, 4)
    s_fc = 1.0 / jnp.sqrt(concat_dim)
    s_ph = 1.0 / jnp.sqrt(embed_dim)
    return {
        "fc_w":    jax.random.uniform(ks[0], (concat_dim, num_classes), jnp.float32, -s_fc, s_fc),
        "fc_b":    jax.random.uniform(ks[1], (num_classes,), jnp.float32, -s_fc, s_fc),
        "patch_w": jax.random.uniform(ks[2], (embed_dim, num_classes), jnp.float32, -s_ph, s_ph),
        "patch_b": jax.random.uniform(ks[3], (num_classes,), jnp.float32, -s_ph, s_ph),
    }


def reference(x, p):
    B, N, E = x.shape
    patch = jnp.einsum("bne,ec->bnc", x[:, 1:, :], p["patch_w"]) + p["patch_b"]
    logits = x.reshape(B, N * E) @ p["fc_w"] + p["fc_b"]
    return logits, patch


if __name__ == "__main__":
    B, N, E, C = 2, 9, 32, 8   # 1 CLS token + 8 patch tokens; concat_dim = N*E
    key = jax.random.PRNGKey(0)
    kx, kp = jax.random.split(key)
    x = jax.random.normal(kx, (B, N, E), jnp.float32)
    params = init_params(kp, embed_dim=E, concat_dim=N * E, num_classes=C)

    logits, patch = concat_forward(x, params)
    jax.block_until_ready((logits, patch))

    ref_logits, ref_patch = reference(x, params)
    assert logits.shape == (B, C), logits.shape
    assert patch.shape == (B, N - 1, C), patch.shape
    assert jnp.allclose(logits, ref_logits, atol=1e-3, rtol=1e-3)
    assert jnp.allclose(patch, ref_patch, atol=1e-3, rtol=1e-3)
    print("KERNEL_OK")
</pallas_src>

<mosaic_0001>
module attributes {stable_mosaic.version = 11 : i64} {
  func.func @_concat_kernel(%arg0: i32, %arg1: memref<18x32xf32, #tpu.memory_space<vmem>>, %arg2: memref<2x288xf32, #tpu.memory_space<vmem>>, %arg3: memref<32x128xf32, #tpu.memory_space<vmem>>, %arg4: memref<1x128xf32, #tpu.memory_space<vmem>>, %arg5: memref<288x128xf32, #tpu.memory_space<vmem>>, %arg6: memref<1x128xf32, #tpu.memory_space<vmem>>, %arg7: memref<2x128xf32, #tpu.memory_space<vmem>>, %arg8: memref<18x128xf32, #tpu.memory_space<vmem>>) attributes {dimension_semantics = [#tpu.dimension_semantics<parallel>], iteration_bounds = array<i64: 1>, scalar_prefetch = 0 : i64, scratch_operands = 0 : i64, tpu.core_type = #tpu.core_type<tc>, window_params = [{transform_indices = @transform_0, window_bounds = array<i64: 18, 32>}, {transform_indices = @transform_1, window_bounds = array<i64: 2, 288>}, {pipeline_mode = #tpu.pipeline_mode<synchronous>, transform_indices = @transform_2, window_bounds = array<i64: 32, 128>}, {pipeline_mode = #tpu.pipeline_mode<synchronous>, transform_indices = @transform_3, window_bounds = array<i64: 1, 128>}, {pipeline_mode = #tpu.pipeline_mode<synchronous>, transform_indices = @transform_4, window_bounds = array<i64: 288, 128>}, {pipeline_mode = #tpu.pipeline_mode<synchronous>, transform_indices = @transform_5, window_bounds = array<i64: 1, 128>}, {transform_indices = @transform_6, window_bounds = array<i64: 2, 128>}, {transform_indices = @transform_7, window_bounds = array<i64: 18, 128>}]} {
    %c0 = arith.constant 0 : index
    %c0_0 = arith.constant 0 : index
    %0 = vector.load %arg1[%c0, %c0_0] : memref<18x32xf32, #tpu.memory_space<vmem>>, vector<18x32xf32>
    %c0_1 = arith.constant 0 : index
    %c0_2 = arith.constant 0 : index
    %1 = vector.load %arg3[%c0_1, %c0_2] : memref<32x128xf32, #tpu.memory_space<vmem>>, vector<32x128xf32>
    %cst = arith.constant dense<0.000000e+00> : vector<18x128xf32>
    %2 = tpu.matmul %0, %1, %cst {dimension_numbers = #tpu.dot_dimension_numbers<[1], [0], [0], [1], [0, 0, 1, 1], [], []>} : vector<18x32xf32>, vector<32x128xf32>, vector<18x128xf32> -> vector<18x128xf32>
    %c0_3 = arith.constant 0 : index
    %c0_4 = arith.constant 0 : index
    %3 = vector.load %arg4[%c0_3, %c0_4] : memref<1x128xf32, #tpu.memory_space<vmem>>, vector<1x128xf32>
    %4 = vector.broadcast %3 : vector<1x128xf32> to vector<18x128xf32>
    %5 = arith.addf %2, %4 : vector<18x128xf32>
    %c0_5 = arith.constant 0 : index
    %c0_6 = arith.constant 0 : index
    %6 = vector.load %arg8[%c0_5, %c0_6] : memref<18x128xf32, #tpu.memory_space<vmem>>, vector<18x128xf32>
    tpu.vector_store %arg8[%c0_5, %c0_6], %5 {strides = array<i32>} : memref<18x128xf32, #tpu.memory_space<vmem>>, vector<18x128xf32>,
    %c0_7 = arith.constant 0 : index
    %c0_8 = arith.constant 0 : index
    %7 = vector.load %arg2[%c0_7, %c0_8] : memref<2x288xf32, #tpu.memory_space<vmem>>, vector<2x288xf32>
    %c0_9 = arith.constant 0 : index
    %c0_10 = arith.constant 0 : index
    %8 = vector.load %arg5[%c0_9, %c0_10] : memref<288x128xf32, #tpu.memory_space<vmem>>, vector<288x128xf32>
    %cst_11 = arith.constant dense<0.000000e+00> : vector<2x128xf32>
    %9 = tpu.matmul %7, %8, %cst_11 {dimension_numbers = #tpu.dot_dimension_numbers<[1], [0], [0], [1], [0, 0, 1, 1], [], []>} : vector<2x288xf32>, vector<288x128xf32>, vector<2x128xf32> -> vector<2x128xf32>
    %c0_12 = arith.constant 0 : index
    %c0_13 = arith.constant 0 : index
    %10 = vector.load %arg6[%c0_12, %c0_13] : memref<1x128xf32, #tpu.memory_space<vmem>>, vector<1x128xf32>
    %11 = vector.broadcast %10 : vector<1x128xf32> to vector<2x128xf32>
    %12 = arith.addf %9, %11 : vector<2x128xf32>
    %c0_14 = arith.constant 0 : index
    %c0_15 = arith.constant 0 : index
    %13 = vector.load %arg7[%c0_14, %c0_15] : memref<2x128xf32, #tpu.memory_space<vmem>>, vector<2x128xf32>
    tpu.vector_store %arg7[%c0_14, %c0_15], %12 {strides = array<i32>} : memref<2x128xf32, #tpu.memory_space<vmem>>, vector<2x128xf32>,
    return
  }
  func.func @transform_0(%arg0: i32) -> (i32, i32) {
    %c0_i32 = arith.constant 0 : i32
    %c0_i32_0 = arith.constant 0 : i32
    return %arg0, %c0_i32 : i32, i32
  }
  func.func @transform_1(%arg0: i32) -> (i32, i32) {
    %c0_i32 = arith.constant 0 : i32
    %c0_i32_0 = arith.constant 0 : i32
    return %arg0, %c0_i32 : i32, i32
  }
  func.func @transform_2(%arg0: i32) -> (i32, i32) {
    %c0_i32 = arith.constant 0 : i32
    %c0_i32_0 = arith.constant 0 : i32
    %c0_i32_1 = arith.constant 0 : i32
    return %c0_i32, %c0_i32_0 : i32, i32
  }
  func.func @transform_3(%arg0: i32) -> (i32, i32) {
    %c0_i32 = arith.constant 0 : i32
    %c0_i32_0 = arith.constant 0 : i32
    %c0_i32_1 = arith.constant 0 : i32
    return %c0_i32, %c0_i32_0 : i32, i32
  }
  func.func @transform_4(%arg0: i32) -> (i32, i32) {
    %c0_i32 = arith.constant 0 : i32
    %c0_i32_0 = arith.constant 0 : i32
    %c0_i32_1 = arith.constant 0 : i32
    return %c0_i32, %c0_i32_0 : i32, i32
  }
  func.func @transform_5(%arg0: i32) -> (i32, i32) {
    %c0_i32 = arith.constant 0 : i32
    %c0_i32_0 = arith.constant 0 : i32
    %c0_i32_1 = arith.constant 0 : i32
    return %c0_i32, %c0_i32_0 : i32, i32
  }
  func.func @transform_6(%arg0: i32) -> (i32, i32) {
    %c0_i32 = arith.constant 0 : i32
    %c0_i32_0 = arith.constant 0 : i32
    return %arg0, %c0_i32 : i32, i32
  }
  func.func @transform_7(%arg0: i32) -> (i32, i32) {
    %c0_i32 = arith.constant 0 : i32
    %c0_i32_0 = arith.constant 0 : i32
    return %arg0, %c0_i32 : i32, i32
  }
}

</mosaic_0001>

<bundles_post_ra>
// kernel: tpu_custom_call.1
= control target key start
LH: loop header
LB: loop body
LE: loop exit
PB: predicated region body
PF: predicated region fallthrough
CT: control target
= control target key end

     0   :  { %13 = vsyncpa [#allocation3], 0  ;;  %s756_s0 = inlined_call_operand.hbm [shape: f32[18,32], index: 0, kind: input, shape index: {}]   ;;  %s757_s1 = inlined_call_operand.hbm [shape: f32[2,288], index: 1, kind: input, shape index: {}]   ;;  %s758_s2 = inlined_call_operand.hbm [shape: f32[32,128], index: 2, kind: input, shape index: {}]   ;;  %s759_s3 = inlined_call_operand.vmem [shape: f32[1,128], index: 3, kind: input, shape index: {}]   ;;  %s760_s4 = inlined_call_operand.hbm [shape: f32[288,128], index: 4, kind: input, shape index: {}]   ;;  %s761_s5 = inlined_call_operand.vmem [shape: f32[1,128], index: 5, kind: input, shape index: {}]   ;;  %s762_s6 = inlined_call_operand.hbm [shape: f32[2,128], index: 6, kind: output, shape index: {0}]   ;;  %s763_s7 = inlined_call_operand.hbm [shape: f32[18,128], index: 7, kind: output, shape index: {1}]  }
   0x1   :  { %14 = vsyncpa [#allocation6], 0 }
   0x2   :  { %15 = vsyncpa [#allocation9], 0 }
   0x3   :  { %16 = vsyncpa [#allocation4], 0 }
   0x4   :  { %17 = vsyncpa [#allocation12], 0  ;;  %s649_s24 = smov [#allocation5]   ;;  %s650_s26 = smov [#allocation2]  }
   0x5   :  { %s36_s25 = sshll.u32 %s649_s24, 4  ;;  %s23_s27 = sshll.u32 %s650_s26, 4  ;;  %s37_s25 = int_to_ptr.vmem [resolvable:$true] %s36_s25  ;;  %s24_s27 = int_to_ptr.vmem [resolvable:$true] %s23_s27 }
   0x6   :  { %s527_s28 = scalar_lea.vmem %s37_s25, 96  ;;  %p532_p1 = scmp.lt.s32.totalorder %s37_s25, %s37_s25 }
   0x7   :  { %p528_p0 = scmp.ne.s32.totalorder %s37_s25, %s527_s28  ;;  %p533_p2 = scmp.lt.s32.totalorder %s527_s28, %s527_s28 }
   0x9   :  { %p534_p3 = por %p533_p2, %p532_p1 }
   0xb   :  { %p535_p4 = pnand %p534_p3, %p528_p0 }
   0xd   :  { %538 = shalt.err (!%p535_p4)
}
   0xe   :  { %39 = dma.hbm_to_vmem [thread:$0]  %s757_s1, 96, %s37_s25, [#allocation6]  }
   0xf   :  { %s547_s8 = scalar_lea.vmem %s24_s27, 384  ;;  %p552_p6 = scmp.lt.s32.totalorder %s24_s27, %s24_s27 }
  0x10   :  { %p548_p5 = scmp.ne.s32.totalorder %s24_s27, %s547_s8  ;;  %p553_p7 = scmp.lt.s32.totalorder %s547_s8, %s547_s8 }
  0x12   :  { %p554_p8 = por %p553_p7, %p552_p6 }
  0x14   :  { %p555_p9 = pnand %p554_p8, %p548_p5 }
  0x16   :  { %558 = shalt.err (!%p555_p9)
}
  0x17   :  { %s651_s9 = smov 128   ;;  %s652_s10 = smov 8  }
  0x18   :  { %29 = dma.hbm_to_vmem [thread:$0]  %s756_s0, 384, %s24_s27, [#allocation3], %s651_s9, %s651_s9, %s652_s10  }
  0x19   :  { %s653_s13 = smov [#allocation7]   ;;  %s654_s15 = smov [#allocation8]  }
  0x1a   :  { %s45_s14 = sshll.u32 %s653_s13, 4  ;;  %s59_s1 = sshll.u32 %s654_s15, 4  ;;  %s46_s14 = int_to_ptr.vmem [resolvable:$true] %s45_s14  ;;  %s60_s1 = int_to_ptr.vmem [resolvable:$true] %s59_s1 }
  0x1b   :  { %s567_s16 = scalar_lea.vmem %s46_s14, 512  ;;  %p572_p11 = scmp.lt.s32.totalorder %s46_s14, %s46_s14 }
  0x1c   :  { %p568_p10 = scmp.ne.s32.totalorder %s46_s14, %s567_s16  ;;  %p573_p12 = scmp.lt.s32.totalorder %s567_s16, %s567_s16 }
  0x1e   :  { %p574_p13 = por %p573_p12, %p572_p11 }
  0x20   :  { %p575_p0 = pnand %p574_p13, %p568_p10 }
  0x22   :  { %578 = shalt.err (!%p575_p0)
}
  0x23   :  { %51 = dma.hbm_to_vmem [thread:$0]  %s758_s2, 512, %s46_s14, [#allocation6], %s651_s9, %s651_s9, %s652_s10  }
  0x24   :  { %s587_s0 = scalar_lea.vmem %s60_s1, 4608  ;;  %p592_p2 = scmp.lt.s32.totalorder %s60_s1, %s60_s1 }
  0x25   :  { %p588_p1 = scmp.ne.s32.totalorder %s60_s1, %s587_s0  ;;  %p593_p3 = scmp.lt.s32.totalorder %s587_s0, %s587_s0 }
  0x27   :  { %p594_p4 = por %p593_p3, %p592_p2 }
  0x29   :  { %p595_p5 = pnand %p594_p4, %p588_p1 }
  0x2b   :  { %598 = shalt.err (!%p595_p5)
}
  0x2c   :  { %65 = dma.hbm_to_vmem [thread:$0]  %s760_s4, 4608, %s60_s1, [#allocation9], %s651_s9, %s651_s9, %s652_s10  }
  0x2d   :  { %639 = dma.done.wait [#allocation3], 384  }
  0x2e   :  { %640 = vsyncadd [#allocation3], 4294966912 }
  0x2f   :  { %641 = dma.done.wait [#allocation6], 608  }
  0x30   :  { %642 = vsyncadd [#allocation6], 4294966688 }
  0x31   :  { %643 = dma.done.wait [#allocation9], 4608  }
  0x32   :  { %644 = vsyncadd [#allocation9], 4294962688  ;;  %v655_v0 = vmov 0.0   ;;  %vm656_vm0 = vmmov 0   ;;  %v219_v1 = vld [vmem:[#allocation8 + $0xf8] sm:$0xff]  ;;  %v218_v3 = vld [vmem:[#allocation8 + $0xf0] sm:$0xff]  ;;  %v236_v8 = vlaneseq }
  0x33   :  { %479 = vmatprep.subr.mxu0 %v655_v0  ;;  %487 = vmatprep.mubr.msk.f32.mxu0 %vm656_vm0, %v655_v0  ;;  %v203_v2 = vld [vmem:[#allocation8 + $0x78] sm:$0xff]  ;;  %v202_v4 = vld [vmem:[#allocation8 + $0x70] sm:$0xff]  ;;  %v217_v5 = vld [vmem:[#allocation8 + $0xe8] sm:$0xff]  ;;  %v657_v6 = vmov 1983009808   ;;  %vm94_vm1 = vcmask 261120  }
  0x34   :  { %439 = vmatprep.subr.mxu1 %v219_v1  ;;  %v234_v7 = vunpack.c.l.s4 %v657_v6  ;;  %v201_v9 = vld [vmem:[#allocation8 + $0x68] sm:$0xff]  ;;  %v216_v10 = vld [vmem:[#allocation8 + $0xe0] sm:$0xff]  ;;  %v86_v12 = vld [vmem:[#allocation7 + $0x18] sm:$0xff]  ;;  %v237_v16 = vshrl.u32 %v236_v8, 7  ;;  %s658_s21 = smov [#allocation11]  }
  0x35   :  { %440 = vmatpush3.msra.mxu1 %v203_v2  ;;  %v200_v11 = vld [vmem:[#allocation8 + $0x60] sm:$0xff]  ;;  %v215_v13 = vld [vmem:[#allocation8 + $0xd8] sm:$0xff]  ;;  %480 = vmatpush3.msra.mxu0 %v86_v12  ;;  %v85_v14 = vld [vmem:[#allocation7 + $0x10] sm:$0xff]  ;;  %s408_s22 = sshll.u32 %s658_s21, 4  ;;  %s409_s22 = int_to_ptr.vmem [resolvable:$true] %s408_s22 }
  0x36   :  { %441 = vmatprep.subr.mxu1 %v218_v3  ;;  %v235_v15 = vunpack.c.0.s8 %v234_v7  ;;  %v199_v17 = vld [vmem:[#allocation8 + $0x58] sm:$0xff]  ;;  %481 = vmatprep.subr.mxu0 %v655_v0  ;;  %v84_v18 = vld [vmem:[#allocation7 + $0x8] sm:$0xff]  ;;  %v214_v19 = vld [vmem:[#allocation8 + $0xd0] sm:$0xff]  ;;  %s599_s23 = scalar_lea.vmem %s409_s22, 384  ;;  %p604_p7 = scmp.lt.s32.totalorder %s409_s22, %s409_s22 }
  0x37   :  { %442 = vmatpush3.msra.mxu1 %v202_v4  ;;  %482 = vmatpush3.msra.mxu0 %v85_v14  ;;  %v198_v20 = vld [vmem:[#allocation8 + $0x50] sm:$0xff]  ;;  %v83_v21 = vld [vmem:[#allocation7] sm:$0xff]  ;;  %v213_v22 = vld [vmem:[#allocation8 + $0xc8] sm:$0xff]  ;;  %p600_p6 = scmp.ne.s32.totalorder %s409_s22, %s599_s23  ;;  %p605_p8 = scmp.lt.s32.totalorder %s599_s23, %s599_s23 }
  0x38   :  { %443 = vmatprep.subr.mxu1 %v217_v5  ;;  %483 = vmatprep.subr.mxu0 %v655_v0  ;;  %v80_v23 = vld [vmem:[#allocation2] sm:$0xff]  ;;  %v238_v24 = vsub.s32 %v235_v15, %v237_v16  ;;  %v223_v27 = vld [vmem:[#allocation8 + $0x118] sm:$0xff]  ;;  %v81_v31 = vld [vmem:[#allocation2 + $0x8] sm:$0xff] }
  0x39   :  { %444 = vmatpush3.msra.mxu1 %v201_v9  ;;  %484 = vmatpush3.msra.mxu0 %v84_v18  ;;  %v197_v25 = vld [vmem:[#allocation8 + $0x48] sm:$0xff]  ;;  %v212_v26 = vld [vmem:[#allocation8 + $0xc0] sm:$0xff]  ;;  %v187_v29 = vld [vmem:[#allocation5] sm:$0x3f]  ;;  %p606_p9 = por %p605_p8, %p604_p7 }
  0x3a   :  { %445 = vmatprep.subr.mxu1 %v216_v10  ;;  %485 = vmatprep.subr.mxu0 %v655_v0  ;;  %v196_v28 = vld [vmem:[#allocation8 + $0x40] sm:$0xff]  ;;  %v211_v30 = vld [vmem:[#allocation8 + $0xb8] sm:$0xff]  ;;  %v239_v32 = vrot.slane %v187_v29, %v238_v24  ;;  %v210_v34 = vld [vmem:[#allocation8 + $0xb0] sm:$0xff]  ;;  %v232_v41 = vcombine.high %v187_v29, %v187_v29 }
  0x3b   :  { %446 = vmatpush3.msra.mxu1 %v200_v11  ;;  %486 = vmatpush3.msra.mxu0 %v83_v21  ;;  %v195_v33 = vld [vmem:[#allocation8 + $0x38] sm:$0xff]  ;;  %v222_v35 = vld [vmem:[#allocation8 + $0x110] sm:$0xff]  ;;  %v209_v38 = vld [vmem:[#allocation8 + $0xa8] sm:$0xff]  ;;  %p607_p10 = pnand %p606_p9, %p600_p6 }
  0x3c   :  { %447 = vmatprep.subr.mxu1 %v215_v13  ;;  %488 = vmatmul.mubr.msk.f32.vlgmr.msra.gmra.mxu0 %vm94_vm1, %v80_v23  ;;  %v194_v36 = vld [vmem:[#allocation8 + $0x30] sm:$0xff]  ;;  %v247_v37 = vcombine.high %v239_v32, %v239_v32  ;;  %v193_v39 = vld [vmem:[#allocation8 + $0x28] sm:$0xff]  ;;  %v208_v40 = vld [vmem:[#allocation8 + $0xa0] sm:$0xff]  ;;  %v246_v49 = vrot.slane %v232_v41, %v238_v24 }
  0x3d   :  { %448 = vmatpush3.msra.mxu1 %v199_v17  ;;  %496 = vmatprep.subr.mxu0 %v655_v0  ;;  %v82_v42 = vld [vmem:[#allocation2 + $0x10] sm:$0x3]  ;;  %v192_v43 = vld [vmem:[#allocation8 + $0x20] sm:$0xff]  ;;  %v221_v44 = vld [vmem:[#allocation8 + $0x108] sm:$0xff] }
  0x3e   :  { %449 = vmatprep.subr.mxu1 %v214_v19  ;;  %497 = vmatpush3.msra.mxu0 %v223_v27  ;;  %v207_v45 = vld [vmem:[#allocation8 + $0x98] sm:$0xff]  ;;  %v220_v47 = vld [vmem:[#allocation8 + $0x100] sm:$0xff]  ;;  %v206_v48 = vld [vmem:[#allocation8 + $0x90] sm:$0xff] }
  0x3f   :  { %450 = vmatpush3.msra.mxu1 %v198_v20  ;;  %490 = vmatprep.mubr.msk.f32.mxu0 %vm656_vm0, %v655_v0  ;;  %v191_v46 = vld [vmem:[#allocation8 + $0x18] sm:$0xff]  ;;  %v190_v50 = vld [vmem:[#allocation8 + $0x10] sm:$0xff]  ;;  %v205_v51 = vld [vmem:[#allocation8 + $0x88] sm:$0xff] }
  0x40   :  { %451 = vmatprep.subr.mxu1 %v213_v22  ;;  %491 = vmatmul.mubr.msk.f32.gmra.mxu0 %vm94_vm1, %v81_v31  ;;  %v189_v52 = vld [vmem:[#allocation8 + $0x8] sm:$0xff]  ;;  %v204_v53 = vld [vmem:[#allocation8 + $0x80] sm:$0xff] }
  0x41   :  { %452 = vmatpush3.msra.mxu1 %v197_v25  ;;  %498 = vmatprep.subr.mxu0 %v655_v0  ;;  %v188_v54 = vld [vmem:[#allocation8] sm:$0xff] }
  0x42   :  { %453 = vmatprep.subr.mxu1 %v212_v26  ;;  %499 = vmatpush3.msra.mxu0 %v222_v35  ;;  %v426_v55 = vld [vmem:[%s759_s3] ss:$0 sm:$0xff] }
  0x43   :  { %454 = vmatpush3.msra.mxu1 %v196_v28  ;;  %493 = vmatprep.mubr.msk.f32.mxu0 %vm656_vm0, %v655_v0 }
  0x44   :  { %455 = vmatprep.subr.mxu1 %v211_v30  ;;  %316 = vmatprep.mubr.f32.mxu1 %v247_v37 }
  0x45   :  { %456 = vmatpush3.msra.mxu1 %v195_v33  ;;  %500 = vmatprep.subr.mxu0 %v655_v0 }
  0x46   :  { %457 = vmatprep.subr.mxu1 %v210_v34  ;;  %494 = vmatmul.mubr.msk.f32.gmra.mxu0 %vm94_vm1, %v82_v42 }
  0x47   :  { %458 = vmatpush3.msra.mxu1 %v194_v36  ;;  %501 = vmatpush3.msra.mxu0 %v221_v44 }
  0x48   :  { %459 = vmatprep.subr.mxu1 %v209_v38  ;;  %502 = vmatprep.subr.mxu0 %v655_v0 }
  0x49   :  { %460 = vmatpush3.msra.mxu1 %v193_v39  ;;  %503 = vmatpush3.msra.mxu0 %v220_v47 }
  0x4a   :  { %461 = vmatprep.subr.mxu1 %v208_v40  ;;  %504 = vmatprep.mubr.msk.f32.mxu0 %vm656_vm0, %v655_v0 }
  0x4b   :  { %462 = vmatpush3.msra.mxu1 %v192_v43  ;;  %505 = vmatmul.mubr.msk.f32.vlgmr.msra.gmra.mxu0 %vm94_vm1, %v246_v49 }
  0x4c   :  { %463 = vmatprep.subr.mxu1 %v207_v45 }
  0x4d   :  { %464 = vmatpush3.msra.mxu1 %v191_v46 }
  0x4e   :  { %465 = vmatprep.subr.mxu1 %v206_v48 }
  0x4f   :  { %466 = vmatpush3.msra.mxu1 %v190_v50 }
  0x50   :  { %467 = vmatprep.subr.mxu1 %v205_v51 }
  0x51   :  { %468 = vmatpush3.msra.mxu1 %v189_v52 }
  0x52   :  { %469 = vmatprep.subr.mxu1 %v204_v53 }
  0x53   :  { %470 = vmatpush3.msra.mxu1 %v188_v54 }
  0x54   :  { %317 = vmatmul.mubr.f32.vlgmr.msra.gmra.mxu1 %v239_v32 }
  0xfc   :  { %v170_v56 = vpop.f32.mrf.mxu0 }
  0xfd   :  { %v171_v57 = vadd.f32 %v426_v55, %v170_v56 }
  0xfe   :  { %v489_v58 = vpop.f32.mrf.mxu0 }
  0xff   :  { %184 = vst [vmem:[#allocation11] sm:$0xff] %v171_v57 }
 0x100   :  { %v175_v59 = vpop.f32.mrf.mxu0 }
 0x101   :  { %v176_v60 = vadd.f32 %v426_v55, %v175_v59 }
 0x102   :  { %v492_v61 = vpop.f32.mrf.mxu0 }
 0x103   :  { %185 = vst [vmem:[#allocation11 + $0x8] sm:$0xff] %v176_v60 }
 0x106   :  { %v180_v62 = vpop.f32.mrf.mxu0 }
 0x107   :  { %v181_v63 = vadd.f32 %v426_v55, %v180_v62 }
 0x108   :  { %v495_v0 = vpop.f32.mrf.mxu0 }
 0x109   :  { %186 = vst [vmem:[#allocation11 + $0x10] sm:$0x3] %v181_v63 }
 0x10a   :  { %610 = shalt.err (!%p607_p10)
}
 0x10b   :  { %414 = dma.vmem_to_hbm [thread:$0]  %s409_s22, 384, %s763_s7, [#allocation12], %s651_s9, %s651_s9, %s652_s10   ;;  %v388_v1 = vpop.f32.mrf.mxu0 }
 0x10c   :  { %v430_v5 = vld [vmem:[%s761_s5] ss:$0 sm:$0xff]  ;;  %s659_s27 = smov [#allocation10]  }
 0x10d   :  { %v506_v2 = vpop.f32.mrf.mxu0  ;;  %s399_s28 = sshll.u32 %s659_s27, 4  ;;  %s400_s28 = int_to_ptr.vmem [resolvable:$true] %s399_s28 }
 0x10e   :  { %s619_s29 = scalar_lea.vmem %s400_s28, 32  ;;  %p624_p12 = scmp.lt.s32.totalorder %s400_s28, %s400_s28 }
 0x10f   :  { %p620_p11 = scmp.ne.s32.totalorder %s400_s28, %s619_s29  ;;  %p625_p13 = scmp.lt.s32.totalorder %s619_s29, %s619_s29 }
 0x111   :  { %p626_p0 = por %p625_p13, %p624_p12 }
 0x113   :  { %p627_p1 = pnand %p626_p0, %p620_p11 }
 0x114   :  { %v471_v3 = vpop.f32.mrf.mxu1 }
 0x116   :  { %v472_v4 = vpop.f32.mrf.mxu1 }
 0x117   :  { %v473_v6 = vadd.f32 %v472_v4, %v471_v3 }
 0x119   :  { %v319_v7 = vadd.f32 %v473_v6, %v430_v5 }
 0x11b   :  { %v389_v8 = vadd.f32 %v388_v1, %v319_v7 }
 0x11d   :  { %392 = vst [vmem:[#allocation10] sm:$0x3] %v389_v8 }
 0x11e   :  { %630 = shalt.err (!%p627_p1)
}
 0x11f   :  { %402 = dma.vmem_to_hbm [thread:$0]  %s400_s28, 32, %s762_s6, [#allocation4]  }
 0x120   :  { %645 = dma.done.wait [#allocation4], 32  }
 0x121   :  { %646 = vsyncadd [#allocation4], 4294967264 }
 0x122   :  { %647 = dma.done.wait [#allocation12], 384  }
 0x123   :  { %648 = vsyncadd [#allocation12], 4294966912 }
 0x124   :  { %421 = vsyncpa [#allocation3], 1 }
 0x125   :  { %422 = vsyncpa [#allocation6], 1 }
 0x126   :  { %423 = vsyncpa [#allocation9], 1 }
 0x127   :  { %424 = vsyncpa [#allocation4], 1 }
 0x128   :  { %425 = vsyncpa [#allocation12], 1 }

</bundles_post_ra>
